<compile_context>
chip_gen: v7x
topology: tpu7x:2x2x1
jax: 0.10.0
libtpu: 0.0.40
codegen_flags: <defaults>
</compile_context>

<pallas_src>
import jax
import jax.numpy as jnp
from jax.experimental import pallas as pl
from jax.experimental.pallas import tpu as pltpu


def larn_kernel(span_emb_ref, noun_emb_ref, q_ref,
                w_nh_ref, b_nh_ref,
                w_mix_ref, b_mix_ref,
                w_rels_ref, b_rels_ref,
                w_rec_ref, b_rec_ref,
                out_ref, rels_ref):
    f32 = jnp.float32
    bf16 = jnp.bfloat16

    # --- l_st: mean of word embeddings over the span (f32) ---
    st = jnp.mean(span_emb_ref[...].astype(f32), axis=1)               # [T, d_word]

    # --- l_noun: single-query (month) attention over noun-word embeddings (f32) ---
    noun = noun_emb_ref[...].astype(f32)                               # [T, Ln, d_word]
    q = q_ref[...].astype(f32)                                         # [T, d_word]
    scores = jnp.sum(noun * q[:, None, :], axis=-1)                    # [T, Ln]
    scores = scores - jnp.max(scores, axis=-1, keepdims=True)
    p = jnp.exp(scores)
    inv_den = pl.reciprocal(jnp.sum(p, axis=-1, keepdims=True), approx=True)
    attn = p * inv_den                                                 # softmax over words
    ctx = jnp.sum(attn[:, :, None] * noun, axis=1)                     # [T, d_word]
    noun_h = jnp.tanh(
        jnp.dot(ctx.astype(bf16), w_nh_ref[...], preferred_element_type=f32)
        + b_nh_ref[...]
    )                                                                  # [T, d_noun_hidden]

    # --- l_mix: concat([st, noun_h, e1, e2]) -> Linear -> ReLU ---
    # (entity contribution is pre-folded into b_mix_ref; st/noun_h fused into one matmul)
    feat = jnp.concatenate([st, noun_h], axis=-1).astype(bf16)         # [T, d_word+d_nh]
    mix = jnp.dot(feat, w_mix_ref[...], preferred_element_type=f32) + b_mix_ref[...]
    mix = jnp.maximum(mix, 0.0)                                        # [T, d_mix]

    # --- l_rels: Linear -> softmax over d_desc (weights lane-padded; pad bias = -1e30) ---
    logits = (jnp.dot(mix.astype(bf16), w_rels_ref[...], preferred_element_type=f32)
              + b_rels_ref[...])
    logits = logits - jnp.max(logits, axis=-1, keepdims=True)
    e = jnp.exp(logits)                                                # pad cols -> 0
    rels = e / jnp.sum(e, axis=-1, keepdims=True)                      # exact divide

    # --- l_recon: Linear(d_desc, d_word), lane-padded ---
    out = (jnp.dot(rels.astype(bf16), w_rec_ref[...], preferred_element_type=f32)
           + b_rec_ref[...])                                           # [T, d_word_pad]

    rels_ref[...] = rels.astype(rels_ref.dtype)
    out_ref[...] = out.astype(out_ref.dtype)


def _round_up(x, m):
    return (x + m - 1) // m * m


def _choose_tile_b(B, per_row_bytes, vmem_budget_bytes=24 * 1024 * 1024):
    # Double-buffered batch-varying tiles must fit the budget (conservative for
    # v7x's 64 MiB VMEM); at least 8 rows, at most 256 (plenty of M for the MXU).
    max_rows = max(8, vmem_budget_bytes // max(2 * per_row_bytes, 1))
    tile = min(256, max_rows, _round_up(B, 8))
    return _round_up(tile, 8)


def larn_forward(params, spans, noun_spans, e1, e2, months, *, tile_b=None):
    """spans/noun_spans: int32 [B, L] word indices; e1/e2: scalar entity ids;
    months: int32 [B] month ids. Returns (recon [B, d_word], rels [B, d_desc])."""
    f32 = jnp.float32
    bf16 = jnp.bfloat16

    We = params["We"]          # [V, d_word]
    Q = params["query"]        # [n_meta, d_word]   (l_noun.query.weight)
    E = params["ent"]          # [n_ent, d_ent]     (l_ent.weight)

    B, Ls = spans.shape
    Ln = noun_spans.shape[1]
    d_word = We.shape[1]
    d_nh = params["w_nh"].shape[1]
    d_mix = params["w_mix_st"].shape[1]
    d_desc = params["w_rels"].shape[1]
    d_word_pad = _round_up(d_word, 128)
    d_desc_pad = _round_up(d_desc, 128)

    # --- glue: embedding-table gathers stay in plain JAX ---
    # TODO(synk): if HBM-bound at scale, move gathers in-kernel via
    # PrefetchScalarGridSpec(num_scalar_prefetch=3) + We in pl.ANY + DMA row gather.
    span_emb = jnp.take(We, spans, axis=0)          # [B, Ls, d_word]
    noun_emb = jnp.take(We, noun_spans, axis=0)     # [B, Ln, d_word]
    q = jnp.take(Q, months, axis=0)                 # [B, d_word]

    # --- fold entity path into the mixing bias (e1/e2 are batch constants) ---
    ent_row = jnp.concatenate([E[e1], E[e2]], axis=-1)[None, :]        # [1, 2*d_ent]
    b_mix_eff = (ent_row @ params["w_mix_ent"] + params["b_mix"]).astype(f32)  # [1, d_mix]

    # --- fuse st/noun mixing weights into one matmul weight ---
    w_mix = jnp.concatenate([params["w_mix_st"], params["w_mix_nh"]], axis=0)  # [d_word+d_nh, d_mix]

    # --- lane-dense padding of the rels / recon layers (softmax-safe) ---
    w_rels = jnp.zeros((d_mix, d_desc_pad), f32).at[:, :d_desc].set(params["w_rels"])
    b_rels = jnp.full((1, d_desc_pad), -1e30, f32).at[:, :d_desc].set(params["b_rels"])
    w_rec = jnp.zeros((d_desc_pad, d_word_pad), f32).at[:d_desc, :d_word].set(params["w_rec"])
    b_rec = jnp.zeros((1, d_word_pad), f32).at[:, :d_word].set(params["b_rec"])

    # bf16 weights for the MXU (biases and softmax/mean math stay f32)
    w_nh = params["w_nh"].astype(bf16)
    w_mix = w_mix.astype(bf16)
    w_rels = w_rels.astype(bf16)
    w_rec = w_rec.astype(bf16)
    b_nh = params["b_nh"].astype(f32)

    # --- batch tiling / padding ---
    per_row_bytes = ((Ls + Ln + 1) * d_word + d_word_pad + d_desc_pad) * 4
    if tile_b is None:
        tile_b = _choose_tile_b(B, per_row_bytes)
    b_pad = _round_up(B, tile_b)
    if b_pad != B:
        pad = b_pad - B
        span_emb = jnp.pad(span_emb, ((0, pad), (0, 0), (0, 0)))
        noun_emb = jnp.pad(noun_emb, ((0, pad), (0, 0), (0, 0)))
        q = jnp.pad(q, ((0, pad), (0, 0)))

    grid = (pl.cdiv(b_pad, tile_b),)

    def rep2(shape):
        return pl.BlockSpec(shape, lambda i: (0, 0))

    in_specs = [
        pl.BlockSpec((tile_b, Ls, d_word), lambda i: (i, 0, 0)),   # span_emb
        pl.BlockSpec((tile_b, Ln, d_word), lambda i: (i, 0, 0)),   # noun_emb
        pl.BlockSpec((tile_b, d_word), lambda i: (i, 0)),          # q
        rep2((d_word, d_nh)),                                      # w_nh
        rep2((1, d_nh)),                                           # b_nh
        rep2((d_word + d_nh, d_mix)),                              # w_mix
        rep2((1, d_mix)),                                          # b_mix (ent folded)
        rep2((d_mix, d_desc_pad)),                                 # w_rels
        rep2((1, d_desc_pad)),                                     # b_rels
        rep2((d_desc_pad, d_word_pad)),                            # w_rec
        rep2((1, d_word_pad)),                                     # b_rec
    ]
    out_specs = (
        pl.BlockSpec((tile_b, d_word_pad), lambda i: (i, 0)),
        pl.BlockSpec((tile_b, d_desc_pad), lambda i: (i, 0)),
    )

    weight_bytes = (d_word * d_nh + (d_word + d_nh) * d_mix
                    + d_mix * d_desc_pad + d_desc_pad * d_word_pad) * 2 \
                   + (d_nh + d_mix + d_desc_pad + d_word_pad) * 4
    tile_bytes = tile_b * per_row_bytes
    vmem_limit = int(min(max(4 * (weight_bytes + 2 * tile_bytes), 16 << 20), 48 << 20))

    out_pad, rels_pad = pl.pallas_call(
        larn_kernel,
        out_shape=(
            jax.ShapeDtypeStruct((b_pad, d_word_pad), jnp.float32),
            jax.ShapeDtypeStruct((b_pad, d_desc_pad), jnp.float32),
        ),
        grid=grid,
        in_specs=in_specs,
        out_specs=out_specs,
        compiler_params=pltpu.CompilerParams(
            dimension_semantics=("parallel",),
            vmem_limit_bytes=vmem_limit,
        ),
    )(span_emb, noun_emb, q, w_nh, b_nh, w_mix, b_mix_eff,
      w_rels, b_rels, w_rec, b_rec)

    return out_pad[:B, :d_word], rels_pad[:B, :d_desc]


def _xavier(key, shape):
    fan_in, fan_out = shape[0], shape[1]
    limit = (6.0 / (fan_in + fan_out)) ** 0.5
    return jax.random.uniform(key, shape, jnp.float32, -limit, limit)


def init_params(key, V, d_word, d_noun_hidden, d_ent, d_mix, d_desc, n_ent, n_meta):
    ks = jax.random.split(key, 12)
    # TODO(synk): d_meta from the original __init__ is not used in this reconstruction
    # (the month query embedding is kept at d_word so scores = <word_emb, query>).
    return {
        "We":        jax.random.normal(ks[0], (V, d_word), jnp.float32) * 0.1,
        "query":     jax.random.normal(ks[1], (n_meta, d_word), jnp.float32) * 0.1,
        "ent":       jax.random.normal(ks[2], (n_ent, d_ent), jnp.float32) * 0.1,
        "w_nh":      _xavier(ks[3], (d_word, d_noun_hidden)),
        "b_nh":      jnp.zeros((1, d_noun_hidden), jnp.float32),
        "w_mix_st":  _xavier(ks[4], (d_word, d_mix)),
        "w_mix_nh":  _xavier(ks[5], (d_noun_hidden, d_mix)),
        "w_mix_ent": _xavier(ks[6], (2 * d_ent, d_mix)),
        "b_mix":     jnp.zeros((1, d_mix), jnp.float32),
        "w_rels":    _xavier(ks[7], (d_mix, d_desc)),
        "b_rels":    jnp.zeros((1, d_desc), jnp.float32),
        "w_rec":     _xavier(ks[8], (d_desc, d_word)),
        "b_rec":     jnp.zeros((1, d_word), jnp.float32),
    }


if __name__ == "__main__":
    # Small, deterministic example shapes.
    B, Ls, Ln = 8, 8, 8
    V, d_word, d_noun_hidden = 64, 32, 32
    d_ent, d_mix, d_desc = 16, 32, 16
    n_ent, n_meta = 10, 12

    key = jax.random.PRNGKey(0)
    kp, k1, k2, k3 = jax.random.split(key, 4)
    params = init_params(kp, V, d_word, d_noun_hidden, d_ent, d_mix, d_desc, n_ent, n_meta)

    spans = jax.random.randint(k1, (B, Ls), 0, V, dtype=jnp.int32)
    noun_spans = jax.random.randint(k2, (B, Ln), 0, V, dtype=jnp.int32)
    months = jax.random.randint(k3, (B,), 0, n_meta, dtype=jnp.int32)
    e1, e2 = 3, 7

    out, rels = jax.jit(larn_forward)(params, spans, noun_spans, e1, e2, months)
    jax.block_until_ready((out, rels))

    assert out.shape == (B, d_word) and rels.shape == (B, d_desc)
    # rels rows must be a probability distribution over d_desc.
    assert bool(jnp.all(jnp.abs(jnp.sum(rels, axis=-1) - 1.0) < 1e-4))
    assert bool(jnp.all(jnp.isfinite(out)))
    print("KERNEL_OK")
</pallas_src>

<mosaic_0001>
module attributes {stable_mosaic.version = 11 : i64} {
  func.func @larn_kernel(%arg0: i32, %arg1: memref<8x8x32xf32, #tpu.memory_space<vmem>>, %arg2: memref<8x8x32xf32, #tpu.memory_space<vmem>>, %arg3: memref<8x32xf32, #tpu.memory_space<vmem>>, %arg4: memref<32x32xbf16, #tpu.memory_space<vmem>>, %arg5: memref<1x32xf32, #tpu.memory_space<vmem>>, %arg6: memref<64x32xbf16, #tpu.memory_space<vmem>>, %arg7: memref<1x32xf32, #tpu.memory_space<vmem>>, %arg8: memref<32x128xbf16, #tpu.memory_space<vmem>>, %arg9: memref<1x128xf32, #tpu.memory_space<vmem>>, %arg10: memref<128x128xbf16, #tpu.memory_space<vmem>>, %arg11: memref<1x128xf32, #tpu.memory_space<vmem>>, %arg12: memref<8x128xf32, #tpu.memory_space<vmem>>, %arg13: memref<8x128xf32, #tpu.memory_space<vmem>>) attributes {dimension_semantics = [#tpu.dimension_semantics<parallel>], iteration_bounds = array<i64: 1>, scalar_prefetch = 0 : i64, scratch_operands = 0 : i64, tpu.core_type = #tpu.core_type<tc>, window_params = [{transform_indices = @transform_0, window_bounds = array<i64: 8, 8, 32>}, {transform_indices = @transform_1, window_bounds = array<i64: 8, 8, 32>}, {transform_indices = @transform_2, window_bounds = array<i64: 8, 32>}, {pipeline_mode = #tpu.pipeline_mode<synchronous>, transform_indices = @transform_3, window_bounds = array<i64: 32, 32>}, {pipeline_mode = #tpu.pipeline_mode<synchronous>, transform_indices = @transform_4, window_bounds = array<i64: 1, 32>}, {pipeline_mode = #tpu.pipeline_mode<synchronous>, transform_indices = @transform_5, window_bounds = array<i64: 64, 32>}, {pipeline_mode = #tpu.pipeline_mode<synchronous>, transform_indices = @transform_6, window_bounds = array<i64: 1, 32>}, {pipeline_mode = #tpu.pipeline_mode<synchronous>, transform_indices = @transform_7, window_bounds = array<i64: 32, 128>}, {pipeline_mode = #tpu.pipeline_mode<synchronous>, transform_indices = @transform_8, window_bounds = array<i64: 1, 128>}, {pipeline_mode = #tpu.pipeline_mode<synchronous>, transform_indices = @transform_9, window_bounds = array<i64: 128, 128>}, {pipeline_mode = #tpu.pipeline_mode<synchronous>, transform_indices = @transform_10, window_bounds = array<i64: 1, 128>}, {transform_indices = @transform_11, window_bounds = array<i64: 8, 128>}, {transform_indices = @transform_12, window_bounds = array<i64: 8, 128>}]} {
    %c0 = arith.constant 0 : index
    %c0_0 = arith.constant 0 : index
    %c0_1 = arith.constant 0 : index
    %0 = vector.load %arg1[%c0, %c0_0, %c0_1] : memref<8x8x32xf32, #tpu.memory_space<vmem>>, vector<8x8x32xf32>
    %cst = arith.constant dense<0.000000e+00> : vector<8x32xf32>
    %1 = vector.multi_reduction <add>, %0, %cst [1] : vector<8x8x32xf32> to vector<8x32xf32>
    %cst_2 = arith.constant 8.000000e+00 : f32
    %2 = vector.broadcast %cst_2 : f32 to vector<8x32xf32>
    %3 = arith.divf %1, %2 : vector<8x32xf32>
    %c0_3 = arith.constant 0 : index
    %c0_4 = arith.constant 0 : index
    %c0_5 = arith.constant 0 : index
    %4 = vector.load %arg2[%c0_3, %c0_4, %c0_5] : memref<8x8x32xf32, #tpu.memory_space<vmem>>, vector<8x8x32xf32>
    %c0_6 = arith.constant 0 : index
    %c0_7 = arith.constant 0 : index
    %5 = vector.load %arg3[%c0_6, %c0_7] : memref<8x32xf32, #tpu.memory_space<vmem>>, vector<8x32xf32>
    %6 = vector.shape_cast %5 : vector<8x32xf32> to vector<8x1x32xf32>
    %7 = vector.broadcast %6 : vector<8x1x32xf32> to vector<8x8x32xf32>
    %8 = arith.mulf %4, %7 : vector<8x8x32xf32>
    %cst_8 = arith.constant dense<0.000000e+00> : vector<8x8xf32>
    %9 = vector.multi_reduction <add>, %8, %cst_8 [2] : vector<8x8x32xf32> to vector<8x8xf32>
    %cst_9 = arith.constant dense<0xFF800000> : vector<8xf32>
    %10 = vector.multi_reduction <maximumf>, %9, %cst_9 [1] : vector<8x8xf32> to vector<8xf32>
    %11 = vector.shape_cast %10 : vector<8xf32> to vector<8x1xf32>
    %12 = vector.broadcast %11 : vector<8x1xf32> to vector<8x8xf32>
    %13 = arith.subf %9, %12 : vector<8x8xf32>
    %14 = math.exp %13 : vector<8x8xf32>
    %cst_10 = arith.constant dense<0.000000e+00> : vector<8xf32>
    %15 = vector.multi_reduction <add>, %14, %cst_10 [1] : vector<8x8xf32> to vector<8xf32>
    %16 = vector.shape_cast %15 : vector<8xf32> to vector<8x1xf32>
    %17 = tpu.reciprocal %16 {approx = true} : vector<8x1xf32> -> vector<8x1xf32>
    %18 = vector.broadcast %17 : vector<8x1xf32> to vector<8x8xf32>
    %19 = arith.mulf %14, %18 : vector<8x8xf32>
    %20 = vector.shape_cast %19 : vector<8x8xf32> to vector<8x8x1xf32>
    %21 = vector.broadcast %20 : vector<8x8x1xf32> to vector<8x8x32xf32>
    %22 = arith.mulf %21, %4 : vector<8x8x32xf32>
    %cst_11 = arith.constant dense<0.000000e+00> : vector<8x32xf32>
    %23 = vector.multi_reduction <add>, %22, %cst_11 [1] : vector<8x8x32xf32> to vector<8x32xf32>
    %24 = arith.truncf %23 : vector<8x32xf32> to vector<8x32xbf16>
    %c0_12 = arith.constant 0 : index
    %c0_13 = arith.constant 0 : index
    %25 = vector.load %arg4[%c0_12, %c0_13] : memref<32x32xbf16, #tpu.memory_space<vmem>>, vector<32x32xbf16>
    %cst_14 = arith.constant dense<0.000000e+00> : vector<8x32xf32>
    %26 = tpu.matmul %24, %25, %cst_14 {dimension_numbers = #tpu.dot_dimension_numbers<[1], [0], [0], [1], [0, 0, 1, 1], [], []>} : vector<8x32xbf16>, vector<32x32xbf16>, vector<8x32xf32> -> vector<8x32xf32>
    %c0_15 = arith.constant 0 : index
    %c0_16 = arith.constant 0 : index
    %27 = vector.load %arg5[%c0_15, %c0_16] : memref<1x32xf32, #tpu.memory_space<vmem>>, vector<1x32xf32>
    %28 = vector.broadcast %27 : vector<1x32xf32> to vector<8x32xf32>
    %29 = arith.addf %26, %28 : vector<8x32xf32>
    %30 = math.tanh %29 : vector<8x32xf32>
    %31 = tpu.concatenate %3, %30 in 1 : vector<8x32xf32>, vector<8x32xf32> -> vector<8x64xf32>
    %32 = arith.truncf %31 : vector<8x64xf32> to vector<8x64xbf16>
    %c0_17 = arith.constant 0 : index
    %c0_18 = arith.constant 0 : index
    %33 = vector.load %arg6[%c0_17, %c0_18] : memref<64x32xbf16, #tpu.memory_space<vmem>>, vector<64x32xbf16>
    %cst_19 = arith.constant dense<0.000000e+00> : vector<8x32xf32>
    %34 = tpu.matmul %32, %33, %cst_19 {dimension_numbers = #tpu.dot_dimension_numbers<[1], [0], [0], [1], [0, 0, 1, 1], [], []>} : vector<8x64xbf16>, vector<64x32xbf16>, vector<8x32xf32> -> vector<8x32xf32>
    %c0_20 = arith.constant 0 : index
    %c0_21 = arith.constant 0 : index
    %35 = vector.load %arg7[%c0_20, %c0_21] : memref<1x32xf32, #tpu.memory_space<vmem>>, vector<1x32xf32>
    %36 = vector.broadcast %35 : vector<1x32xf32> to vector<8x32xf32>
    %37 = arith.addf %34, %36 : vector<8x32xf32>
    %cst_22 = arith.constant 0.000000e+00 : f32
    %38 = vector.broadcast %cst_22 : f32 to vector<8x32xf32>
    %39 = arith.maximumf %37, %38 : vector<8x32xf32>
    %40 = arith.truncf %39 : vector<8x32xf32> to vector<8x32xbf16>
    %c0_23 = arith.constant 0 : index
    %c0_24 = arith.constant 0 : index
    %41 = vector.load %arg8[%c0_23, %c0_24] : memref<32x128xbf16, #tpu.memory_space<vmem>>, vector<32x128xbf16>
    %cst_25 = arith.constant dense<0.000000e+00> : vector<8x128xf32>
    %42 = tpu.matmul %40, %41, %cst_25 {dimension_numbers = #tpu.dot_dimension_numbers<[1], [0], [0], [1], [0, 0, 1, 1], [], []>} : vector<8x32xbf16>, vector<32x128xbf16>, vector<8x128xf32> -> vector<8x128xf32>
    %c0_26 = arith.constant 0 : index
    %c0_27 = arith.constant 0 : index
    %43 = vector.load %arg9[%c0_26, %c0_27] : memref<1x128xf32, #tpu.memory_space<vmem>>, vector<1x128xf32>
    %44 = vector.broadcast %43 : vector<1x128xf32> to vector<8x128xf32>
    %45 = arith.addf %42, %44 : vector<8x128xf32>
    %cst_28 = arith.constant dense<0xFF800000> : vector<8xf32>
    %46 = vector.multi_reduction <maximumf>, %45, %cst_28 [1] : vector<8x128xf32> to vector<8xf32>
    %47 = vector.shape_cast %46 : vector<8xf32> to vector<8x1xf32>
    %48 = vector.broadcast %47 : vector<8x1xf32> to vector<8x128xf32>
    %49 = arith.subf %45, %48 : vector<8x128xf32>
    %50 = math.exp %49 : vector<8x128xf32>
    %cst_29 = arith.constant dense<0.000000e+00> : vector<8xf32>
    %51 = vector.multi_reduction <add>, %50, %cst_29 [1] : vector<8x128xf32> to vector<8xf32>
    %52 = vector.shape_cast %51 : vector<8xf32> to vector<8x1xf32>
    %53 = vector.broadcast %52 : vector<8x1xf32> to vector<8x128xf32>
    %54 = arith.divf %50, %53 : vector<8x128xf32>
    %55 = arith.truncf %54 : vector<8x128xf32> to vector<8x128xbf16>
    %c0_30 = arith.constant 0 : index
    %c0_31 = arith.constant 0 : index
    %56 = vector.load %arg10[%c0_30, %c0_31] : memref<128x128xbf16, #tpu.memory_space<vmem>>, vector<128x128xbf16>
    %cst_32 = arith.constant dense<0.000000e+00> : vector<8x128xf32>
    %57 = tpu.matmul %55, %56, %cst_32 {dimension_numbers = #tpu.dot_dimension_numbers<[1], [0], [0], [1], [0, 0, 1, 1], [], []>} : vector<8x128xbf16>, vector<128x128xbf16>, vector<8x128xf32> -> vector<8x128xf32>
    %c0_33 = arith.constant 0 : index
    %c0_34 = arith.constant 0 : index
    %58 = vector.load %arg11[%c0_33, %c0_34] : memref<1x128xf32, #tpu.memory_space<vmem>>, vector<1x128xf32>
    %59 = vector.broadcast %58 : vector<1x128xf32> to vector<8x128xf32>
    %60 = arith.addf %57, %59 : vector<8x128xf32>
    %c0_35 = arith.constant 0 : index
    %c0_36 = arith.constant 0 : index
    %61 = vector.load %arg13[%c0_35, %c0_36] : memref<8x128xf32, #tpu.memory_space<vmem>>, vector<8x128xf32>
    tpu.vector_store %arg13[%c0_35, %c0_36], %54 {strides = array<i32>} : memref<8x128xf32, #tpu.memory_space<vmem>>, vector<8x128xf32>,
    %c0_37 = arith.constant 0 : index
    %c0_38 = arith.constant 0 : index
    %62 = vector.load %arg12[%c0_37, %c0_38] : memref<8x128xf32, #tpu.memory_space<vmem>>, vector<8x128xf32>
    tpu.vector_store %arg12[%c0_37, %c0_38], %60 {strides = array<i32>} : memref<8x128xf32, #tpu.memory_space<vmem>>, vector<8x128xf32>,
    return
  }
  func.func @transform_0(%arg0: i32) -> (i32, i32, i32) {
    %c0_i32 = arith.constant 0 : i32
    %c0_i32_0 = arith.constant 0 : i32
    %c0_i32_1 = arith.constant 0 : i32
    return %arg0, %c0_i32, %c0_i32_0 : i32, i32, i32
  }
  func.func @transform_1(%arg0: i32) -> (i32, i32, i32) {
    %c0_i32 = arith.constant 0 : i32
    %c0_i32_0 = arith.constant 0 : i32
    %c0_i32_1 = arith.constant 0 : i32
    return %arg0, %c0_i32, %c0_i32_0 : i32, i32, i32
  }
  func.func @transform_2(%arg0: i32) -> (i32, i32) {
    %c0_i32 = arith.constant 0 : i32
    %c0_i32_0 = arith.constant 0 : i32
    return %arg0, %c0_i32 : i32, i32
  }
  func.func @transform_3(%arg0: i32) -> (i32, i32) {
    %c0_i32 = arith.constant 0 : i32
    %c0_i32_0 = arith.constant 0 : i32
    %c0_i32_1 = arith.constant 0 : i32
    return %c0_i32, %c0_i32_0 : i32, i32
  }
  func.func @transform_4(%arg0: i32) -> (i32, i32) {
    %c0_i32 = arith.constant 0 : i32
    %c0_i32_0 = arith.constant 0 : i32
    %c0_i32_1 = arith.constant 0 : i32
    return %c0_i32, %c0_i32_0 : i32, i32
  }
  func.func @transform_5(%arg0: i32) -> (i32, i32) {
    %c0_i32 = arith.constant 0 : i32
    %c0_i32_0 = arith.constant 0 : i32
    %c0_i32_1 = arith.constant 0 : i32
    return %c0_i32, %c0_i32_0 : i32, i32
  }
  func.func @transform_6(%arg0: i32) -> (i32, i32) {
    %c0_i32 = arith.constant 0 : i32
    %c0_i32_0 = arith.constant 0 : i32
    %c0_i32_1 = arith.constant 0 : i32
    return %c0_i32, %c0_i32_0 : i32, i32
  }
  func.func @transform_7(%arg0: i32) -> (i32, i32) {
    %c0_i32 = arith.constant 0 : i32
    %c0_i32_0 = arith.constant 0 : i32
    %c0_i32_1 = arith.constant 0 : i32
    return %c0_i32, %c0_i32_0 : i32, i32
  }
  func.func @transform_8(%arg0: i32) -> (i32, i32) {
    %c0_i32 = arith.constant 0 : i32
    %c0_i32_0 = arith.constant 0 : i32
    %c0_i32_1 = arith.constant 0 : i32
    return %c0_i32, %c0_i32_0 : i32, i32
  }
  func.func @transform_9(%arg0: i32) -> (i32, i32) {
    %c0_i32 = arith.constant 0 : i32
    %c0_i32_0 = arith.constant 0 : i32
    %c0_i32_1 = arith.constant 0 : i32
    return %c0_i32, %c0_i32_0 : i32, i32
  }
  func.func @transform_10(%arg0: i32) -> (i32, i32) {
    %c0_i32 = arith.constant 0 : i32
    %c0_i32_0 = arith.constant 0 : i32
    %c0_i32_1 = arith.constant 0 : i32
    return %c0_i32, %c0_i32_0 : i32, i32
  }
  func.func @transform_11(%arg0: i32) -> (i32, i32) {
    %c0_i32 = arith.constant 0 : i32
    %c0_i32_0 = arith.constant 0 : i32
    return %arg0, %c0_i32 : i32, i32
  }
  func.func @transform_12(%arg0: i32) -> (i32, i32) {
    %c0_i32 = arith.constant 0 : i32
    %c0_i32_0 = arith.constant 0 : i32
    return %arg0, %c0_i32 : i32, i32
  }
}

</mosaic_0001>

<bundles_post_ra>
// kernel: larn_forward.1
= control target key start
LH: loop header
LB: loop body
LE: loop exit
PB: predicated region body
PF: predicated region fallthrough
CT: control target
= control target key end

     0   :  { %18 = vsyncpa [#allocation3], 0  ;;  %v131_v0 = vlaneseq  ;;  %v1215_v1 = vmov 1966171168   ;;  %vm51_vm0 = vcmask 261120   ;;  %s1609_s0 = inlined_call_operand.vmem [shape: f32[8,8,32], index: 0, kind: input, shape index: {}]   ;;  %s1610_s1 = inlined_call_operand.vmem [shape: f32[8,8,32], index: 1, kind: input, shape index: {}]   ;;  %s1611_s2 = inlined_call_operand.vmem [shape: f32[8,32], index: 2, kind: input, shape index: {}]   ;;  %s1612_s3 = inlined_call_operand.vmem [shape: bf16[32,32], index: 3, kind: input, shape index: {}]   ;;  %s1613_s4 = inlined_call_operand.vmem [shape: f32[1,32], index: 4, kind: input, shape index: {}]   ;;  %s1614_s5 = inlined_call_operand.vmem [shape: bf16[64,32], index: 5, kind: input, shape index: {}]   ;;  %s1615_s6 = inlined_call_operand.vmem [shape: f32[1,32], index: 6, kind: input, shape index: {}]   ;;  %s1616_s7 = inlined_call_operand.vmem [shape: bf16[32,128], index: 7, kind: input, shape index: {}]   ;;  %s1617_s8 = inlined_call_operand.vmem [shape: f32[1,128], index: 8, kind: input, shape index: {}]   ;;  %s1618_s9 = inlined_call_operand.vmem [shape: bf16[128,128], index: 9, kind: input, shape index: {}]   ;;  %s1619_s10 = inlined_call_operand.vmem [shape: f32[1,128], index: 10, kind: input, shape index: {}]   ;;  %s1620_s11 = inlined_call_operand.hbm [shape: f32[8,128], index: 11, kind: output, shape index: {0}]   ;;  %s1621_s12 = inlined_call_operand.hbm [shape: f32[8,128], index: 12, kind: output, shape index: {1}]  }
   0x1   :  { %v129_v2 = vunpack.c.l.s4 %v1215_v1  ;;  %v125_v3 = vld [vmem:[%s1611_s2] sm:$0xff]  ;;  %v1307_v18 = vld [vmem:[%s1610_s1 + $0x10] sm:$0xff]  ;;  %v1312_v19 = vld [vmem:[%s1610_s1 + $0x8] sm:$0xff] }
   0x2   :  { %v1290_v4 = vshrl.u32 %v131_v0, 7  ;;  %v257_v5 = vand.u32 127, %v131_v0  ;;  %v127_v6 = vcombine.high %v125_v3, %v125_v3  ;;  %v1302_v13 = vld [vmem:[%s1610_s1] sm:$0xff]  ;;  %v1317_v20 = vld [vmem:[%s1610_s1 + $0x28] sm:$0xff] }
   0x3   :  { %v130_v7 = vunpack.c.0.s8 %v129_v2  ;;  %v1328_v31 = vld [vmem:[%s1610_s1 + $0x20] sm:$0xff] }
   0x4   :  { %v1293_v8 = vsub.s32 0, %v1290_v4  ;;  %v1296_v9 = vsub.s32 %v257_v5, %v1290_v4 }
   0x5   :  { %v133_v10 = vsub.s32 %v130_v7, %v1290_v4 }
   0x7   :  { %v134_v11 = vrot.slane %v125_v3, %v133_v10  ;;  %v141_v12 = vrot.slane %v127_v6, %v133_v10 }
   0x9   :  { %v150_v14 = vrot.slane %v134_v11, %v133_v10  ;;  %v142_v15 = vcombine.high %v134_v11, %v134_v11  ;;  %v143_v16 = vcombine.high %v141_v12, %v141_v12  ;;  %v157_v17 = vrot.slane %v141_v12, %v133_v10 }
   0xb   :  { %v179_v21 = vrot.slane %v150_v14, %v1293_v8  ;;  %v172_v22 = vcombine.high %v150_v14, %v150_v14  ;;  %v164_v23 = vrot.slane %v142_v15, %v133_v10  ;;  %v171_v24 = vrot.slane %v143_v16, %v133_v10 }
   0xc   :  { %v195_v25 = vrot.slane %v157_v17, %v1293_v8  ;;  %v173_v26 = vcombine.high %v157_v17, %v157_v17 }
   0xd   :  { %v216_v27 = vmul.f32 %v179_v21, %v1302_v13  ;;  %v187_v28 = vrot.slane %v172_v22, %v1293_v8  ;;  %v183_v29 = vrot.slane %v164_v23, %v1293_v8  ;;  %v199_v30 = vrot.slane %v171_v24, %v1293_v8 }
   0xe   :  { %v174_v32 = vcombine.high %v164_v23, %v164_v23  ;;  %v175_v33 = vcombine.high %v171_v24, %v171_v24 }
   0xf   :  { %19 = vsyncpa [#allocation5], 0  ;;  %v224_v34 = vsel %vm51_vm0, %v216_v27, 0.0  ;;  %v218_v35 = vmul.f32 %v187_v28, %v1307_v18  ;;  %v217_v36 = vmul.f32 %v183_v29, %v1312_v19  ;;  %v221_v37 = vmul.f32 %v199_v30, %v1317_v20  ;;  %v1337_v38 = vld [vmem:[%s1610_s1 + $0x18] sm:$0xff]  ;;  %v1347_v44 = vld [vmem:[%s1610_s1 + $0x30] sm:$0xff]  ;;  %s1219_s13 = smov 32  }
  0x10   :  { %225 = vadd.xlane.f32.xlu0 %v224_v34  ;;  %v191_v39 = vrot.slane %v174_v32, %v1293_v8  ;;  %v220_v42 = vmul.f32 %v195_v25, %v1328_v31  ;;  %v203_v43 = vrot.slane %v173_v26, %v1293_v8  ;;  %v207_v47 = vrot.slane %v175_v33, %v1293_v8  ;;  %v1355_v48 = vld [vmem:[%s1610_s1 + $0x38] sm:$0xff]  ;;  %s1220_s23 = smov [#allocation4]  }
  0x11   :  { %v230_v40 = vsel %vm51_vm0, %v218_v35, 0.0  ;;  %v227_v41 = vsel %vm51_vm0, %v217_v36, 0.0  ;;  %v239_v45 = vsel %vm51_vm0, %v221_v37, 0.0  ;;  %vm290_vm1 = vcmask 1041409   ;;  %s1014_s24 = sshll.u32 %s1220_s23, 4  ;;  %s1015_s24 = int_to_ptr.vmem [resolvable:$true] %s1014_s24 }
  0x12   :  { %231 = vadd.xlane.f32.xlu1 %v230_v40  ;;  %v219_v46 = vmul.f32 %v191_v39, %v1337_v38  ;;  %v236_v49 = vsel %vm51_vm0, %v220_v42, 0.0  ;;  %v222_v50 = vmul.f32 %v203_v43, %v1347_v44  ;;  %v223_v52 = vmul.f32 %v207_v47, %v1355_v48  ;;  %s1167_s2 = scalar_lea.vmem %s1015_s24, 128  ;;  %p1172_p1 = scmp.lt.s32.totalorder %s1015_s24, %s1015_s24 }
  0x13   :  { %vm292_vm2 = vcmask 1042434   ;;  %vm294_vm3 = vcmask 1043459   ;;  %vm296_vm4 = vcmask 1044484   ;;  %vm298_vm5 = vcmask 1045509   ;;  %p1168_p0 = scmp.ne.s32.totalorder %s1015_s24, %s1167_s2  ;;  %p1173_p2 = scmp.lt.s32.totalorder %s1167_s2, %s1167_s2 }
  0x14   :  { %228 = vadd.xlane.f32.xlu0 %v227_v41  ;;  %v233_v51 = vsel %vm51_vm0, %v219_v46, 0.0  ;;  %v242_v53 = vsel %vm51_vm0, %v222_v50, 0.0  ;;  %v245_v54 = vsel %vm51_vm0, %v223_v52, 0.0  ;;  %vm300_vm6 = vcmask 1046534  }
  0x15   :  { %vm302_vm7 = vcmask 1047559   ;;  %vm305_vm8 = vcmask 64512   ;;  %v1216_v22 = vmov 0   ;;  %v316_v23 = vsub.s32 1, %v1290_v4  ;;  %p1174_p3 = por %p1173_p2, %p1172_p1 }
  0x16   :  { %240 = vadd.xlane.f32.xlu1 %v239_v45  ;;  %1125 = vset.pattern.permute.xlu0 %v1216_v22  ;;  %v320_v24 = vsub.s32 2, %v1290_v4  ;;  %v324_v25 = vsub.s32 3, %v1290_v4  ;;  %v328_v30 = vsub.s32 4, %v1290_v4  ;;  %v332_v39 = vsub.s32 5, %v1290_v4 }
  0x17   :  { %1124 = vset.pattern.permute.xlu1 %v1216_v22  ;;  %v336_v43 = vsub.s32 6, %v1290_v4  ;;  %vm1218_vm9 = vmmov 0   ;;  %vm763_vm10 = vcmask 523264   ;;  %p1175_p4 = pnand %p1174_p3, %p1168_p0 }
  0x18   :  { %237 = vadd.xlane.f32.xlu0 %v236_v49  ;;  %v340_v49 = vsub.s32 7, %v1290_v4  ;;  %v1128_v4 = vld [vmem:[%s1612_s3 + $0x8] sm:$0xff]  }
  0x1a   :  { %234 = vadd.xlane.f32.xlu1 %v233_v51 }
  0x1c   :  { %243 = vadd.xlane.f32.xlu0 %v242_v53 }
  0x1e   :  { %246 = vadd.xlane.f32.xlu1 %v245_v54 }
  0x9d   :  { %v226_v55 = vpop.xlane.xlu0 %225 }
  0x9e   :  { %v261_v60 = vrot.slane %v226_v55, %v1296_v9 }
  0x9f   :  { %v232_v56 = vpop.xlane.xlu1 %231 }
  0xa0   :  { %v269_v63 = vrot.slane %v232_v56, %v1296_v9 }
  0xa1   :  { %v229_v57 = vpop.xlane.xlu0 %228 }
  0xa2   :  { %v265_v58 = vrot.slane %v229_v57, %v1296_v9 }
  0xa3   :  { %v1364_v59 = vpop.xlane.xlu1 %240 }
  0xa4   :  { %v291_v62 = vsel %vm290_vm1, %v265_v58, %v261_v60  ;;  %v281_v6 = vrot.slane %v1364_v59, %v1296_v9 }
  0xa5   :  { %v238_v61 = vpop.xlane.xlu0 %237  ;;  %v293_v3 = vsel %vm292_vm2, %v269_v63, %v291_v62 }
  0xa6   :  { %v277_v2 = vrot.slane %v238_v61, %v1296_v9 }
  0xa7   :  { %v235_v0 = vpop.xlane.xlu1 %234 }
  0xa8   :  { %v273_v1 = vrot.slane %v235_v0, %v1296_v9 }
  0xa9   :  { %v244_v5 = vpop.xlane.xlu0 %243 }
  0xaa   :  { %v295_v7 = vsel %vm294_vm3, %v273_v1, %v293_v3  ;;  %v285_v10 = vrot.slane %v244_v5, %v1296_v9 }
  0xab   :  { %v247_v11 = vpop.xlane.xlu1 %246  ;;  %v297_v12 = vsel %vm296_vm4, %v277_v2, %v295_v7 }
  0xac   :  { %v289_v14 = vrot.slane %v247_v11, %v1296_v9  ;;  %v299_v15 = vsel %vm298_vm5, %v281_v6, %v297_v12 }
  0xad   :  { %v301_v16 = vsel %vm300_vm6, %v285_v10, %v299_v15 }
  0xae   :  { %v303_v17 = vsel %vm302_vm7, %v289_v14, %v301_v16 }
  0xaf   :  { %v306_v21 = vsel %vm305_vm8, %v303_v17, -inf }
  0xb0   :  { %307 = vmax.xlane.f32.xlu0 %v306_v21 }
 0x13d   :  { %v308_v26 = vpop.xlane.xlu0 %307 }
 0x13e   :  { %v313_v27 = vrot.slane %v308_v26, %v1293_v8  ;;  %v317_v28 = vrot.slane %v308_v26, %v316_v23  ;;  %v321_v29 = vrot.slane %v308_v26, %v320_v24  ;;  %v325_v32 = vrot.slane %v308_v26, %v324_v25 }
 0x13f   :  { %v329_v40 = vrot.slane %v308_v26, %v328_v30  ;;  %v333_v45 = vrot.slane %v308_v26, %v332_v39  ;;  %v337_v50 = vrot.slane %v308_v26, %v336_v43 }
 0x140   :  { %v350_v33 = vsub.f32 %v226_v55, %v313_v27  ;;  %v351_v34 = vsub.f32 %v229_v57, %v317_v28  ;;  %v352_v35 = vsub.f32 %v232_v56, %v321_v29  ;;  %v353_v41 = vsub.f32 %v235_v0, %v325_v32 }
 0x141   :  { %v354_v46 = vsub.f32 %v238_v61, %v329_v40  ;;  %v355_v51 = vsub.f32 %v1364_v59, %v333_v45  ;;  %v341_v55 = vrot.slane %v308_v26, %v340_v49  ;;  %v356_v56 = vsub.f32 %v244_v5, %v337_v50 }
 0x142   :  { %v358_v36 = vmul.f32 1.442695, %v350_v33  ;;  %v360_v37 = vmul.f32 1.442695, %v351_v34  ;;  %v362_v42 = vmul.f32 1.442695, %v352_v35 }
 0x143   :  { %v364_v47 = vmul.f32 1.442695, %v353_v41  ;;  %v366_v52 = vmul.f32 1.442695, %v354_v46  ;;  %v368_v57 = vmul.f32 1.442695, %v355_v51  ;;  %v357_v60 = vsub.f32 %v247_v11, %v341_v55 }
 0x144   :  { %1143 = vpow2.f32 %v358_v36  ;;  %v370_v61 = vmul.f32 1.442695, %v356_v56 }
 0x145   :  { %1145 = vpow2.f32 %v360_v37  ;;  %v372_v59 = vmul.f32 1.442695, %v357_v60 }
 0x146   :  { %1147 = vpow2.f32 %v362_v42 }
 0x147   :  { %1149 = vpow2.f32 %v364_v47 }
 0x148   :  { %1151 = vpow2.f32 %v366_v52 }
 0x149   :  { %1153 = vpow2.f32 %v368_v57 }
 0x14a   :  { %1155 = vpow2.f32 %v370_v61 }
 0x14b   :  { %1157 = vpow2.f32 %v372_v59 }
 0x14e   :  { %v1144_v53 = vpop.eup %1143 }
 0x14f   :  { %v1146_v54 = vpop.eup %1145  ;;  %383 = vperm.xlu1 %1124, %v1144_v53  }
 0x150   :  { %386 = vperm.xlu0 %1125, %v1146_v54   ;;  %v1148_v58 = vpop.eup %1147 }
 0x151   :  { %v1150_v62 = vpop.eup %1149 }
 0x152   :  { %v1152_v63 = vpop.eup %1151 }
 0x153   :  { %389 = vperm.xlu1 %1124, %v1148_v58   ;;  %v1154_v0 = vpop.eup %1153 }
 0x154   :  { %v1156_v1 = vpop.eup %1155 }
 0x155   :  { %v1158_v2 = vpop.eup %1157 }
 0x157   :  { %392 = vperm.xlu1 %1124, %v1150_v62  }
 0x15b   :  { %395 = vperm.xlu1 %1124, %v1152_v63  }
 0x15f   :  { %398 = vperm.xlu1 %1124, %v1154_v0  }
 0x163   :  { %401 = vperm.xlu1 %1124, %v1156_v1  }
 0x167   :  { %404 = vperm.xlu1 %1124, %v1158_v2  }
 0x1ce   :  { %v384_v3 = vpop.permute.xlu1 %383 }
 0x1cf   :  { %v387_v10 = vpop.permute.xlu0 %386  ;;  %v409_v14 = vrot.slane %v384_v3, %v1296_v9 }
 0x1d0   :  { %v413_v12 = vrot.slane %v387_v10, %v1296_v9 }
 0x1d2   :  { %v390_v5 = vpop.permute.xlu1 %389  ;;  %v438_v22 = vsel %vm290_vm1, %v413_v12, %v409_v14 }
 0x1d3   :  { %v417_v15 = vrot.slane %v390_v5, %v1296_v9 }
 0x1d5   :  { %v439_v27 = vsel %vm292_vm2, %v417_v15, %v438_v22 }
 0x1d6   :  { %v393_v6 = vpop.permute.xlu1 %392 }
 0x1d7   :  { %v421_v16 = vrot.slane %v393_v6, %v1296_v9 }
 0x1d9   :  { %v440_v29 = vsel %vm294_vm3, %v421_v16, %v439_v27 }
 0x1da   :  { %v396_v7 = vpop.permute.xlu1 %395 }
 0x1db   :  { %v425_v17 = vrot.slane %v396_v7, %v1296_v9 }
 0x1dd   :  { %v441_v32 = vsel %vm296_vm4, %v425_v17, %v440_v29 }
 0x1de   :  { %v399_v11 = vpop.permute.xlu1 %398 }
 0x1df   :  { %v429_v26 = vrot.slane %v399_v11, %v1296_v9 }
 0x1e1   :  { %v442_v34 = vsel %vm298_vm5, %v429_v26, %v441_v32 }
 0x1e2   :  { %v402_v21 = vpop.permute.xlu1 %401 }
 0x1e3   :  { %v433_v28 = vrot.slane %v402_v21, %v1296_v9 }
 0x1e5   :  { %v443_v36 = vsel %vm300_vm6, %v433_v28, %v442_v34 }
 0x1e6   :  { %v405_v33 = vpop.permute.xlu1 %404 }
 0x1e7   :  { %v437_v35 = vrot.slane %v405_v33, %v1296_v9 }
 0x1e9   :  { %v444_v37 = vsel %vm302_vm7, %v437_v35, %v443_v36 }
 0x1ea   :  { %v446_v40 = vsel %vm305_vm8, %v444_v37, 0.0 }
 0x1eb   :  { %447 = vadd.xlane.f32.xlu1 %v446_v40 }
 0x278   :  { %v448_v41 = vpop.xlane.xlu1 %447 }
 0x279   :  { %1159 = vrcp.f32 %v448_v41 }
 0x283   :  { %v1160_v42 = vpop.eup %1159 }
 0x284   :  { %v454_v45 = vrot.slane %v1160_v42, %v1293_v8  ;;  %v458_v47 = vrot.slane %v1160_v42, %v316_v23  ;;  %v462_v9 = vrot.slane %v1160_v42, %v320_v24  ;;  %v466_v52 = vrot.slane %v1160_v42, %v324_v25 }
 0x285   :  { %v470_v56 = vrot.slane %v1160_v42, %v328_v30  ;;  %v474_v23 = vrot.slane %v1160_v42, %v332_v39  ;;  %v478_v24 = vrot.slane %v1160_v42, %v336_v43  ;;  %v482_v25 = vrot.slane %v1160_v42, %v340_v49  ;;  %v1127_v30 = vld [vmem:[%s1612_s3] sm:$0xff]  }
 0x286   :  { %v491_v46 = vmul.f32 %v1144_v53, %v454_v45  ;;  %v492_v50 = vmul.f32 %v1146_v54, %v458_v47  ;;  %v493_v51 = vmul.f32 %v1148_v58, %v462_v9  ;;  %v494_v55 = vmul.f32 %v1150_v62, %v466_v52 }
 0x287   :  { %v495_v8 = vmul.f32 %v1152_v63, %v470_v56  ;;  %v496_v53 = vmul.f32 %v1154_v0, %v474_v23  ;;  %v497_v54 = vmul.f32 %v1156_v1, %v478_v24  ;;  %v498_v57 = vmul.f32 %v1158_v2, %v482_v25 }
 0x288   :  { %501 = vperm.xlu0 %1125, %v491_v46   ;;  %v1217_v58 = vmov 0.0  }
 0x289   :  { %1069 = vmatprep.subr.bf16.mxu1 %v1217_v58  ;;  %1073 = vmatprep.mubr.msk.bf16.mxu1 %vm1218_vm9, %v1217_v58 }
 0x28a   :  { %1070 = vmatpush3.bf16.msra.mxu1 %v1127_v30  ;;  %1097 = vmatprep.subr.bf16.mxu0 %v1217_v58 }
 0x28b   :  { %1071 = vmatprep.subr.bf16.mxu1 %v1217_v58  ;;  %1113 = vmatprep.mubr.msk.bf16.mxu0 %vm1218_vm9, %v1217_v58 }
 0x28c   :  { %506 = vperm.xlu0 %1125, %v492_v50  }
 0x28e   :  { %1072 = vmatpush3.bf16.msra.mxu1 %v1128_v4 }
 0x28f   :  { %1077 = vmatprep.subr.bf16.mxu1 %v1217_v58 }
 0x290   :  { %511 = vperm.xlu0 %1125, %v493_v51  }
 0x294   :  { %516 = vperm.xlu0 %1125, %v494_v55  }
 0x298   :  { %521 = vperm.xlu0 %1125, %v495_v8  }
 0x29c   :  { %526 = vperm.xlu0 %1125, %v496_v53  }
 0x2a0   :  { %531 = vperm.xlu0 %1125, %v497_v54  }
 0x2a4   :  { %536 = vperm.xlu0 %1125, %v498_v57  }
 0x307   :  { %v502_v39 = vpop.permute.xlu0 %501 }
 0x308   :  { %v539_v49 = vmul.f32 %v502_v39, %v1302_v13 }
 0x30a   :  { %v547_v59 = vsel %vm51_vm0, %v539_v49, 0.0 }
 0x30b   :  { %v507_v43 = vpop.permute.xlu0 %506  ;;  %v548_v2 = vrot.slane %v547_v59, 4 }
 0x30c   :  { %v540_v60 = vmul.f32 %v507_v43, %v1312_v19 }
 0x30d   :  { %v549_v19 = vadd.f32 %v548_v2, %v547_v59 }
 0x30e   :  { %v554_v61 = vsel %vm51_vm0, %v540_v60, 0.0 }
 0x30f   :  { %v512_v62 = vpop.permute.xlu0 %511  ;;  %v555_v0 = vrot.slane %v554_v61, 4  ;;  %v550_v21 = vrot.slane %v549_v19, 2 }
 0x310   :  { %v541_v63 = vmul.f32 %v512_v62, %v1307_v18 }
 0x311   :  { %v556_v7 = vadd.f32 %v555_v0, %v554_v61  ;;  %v551_v34 = vadd.f32 %v550_v21, %v549_v19 }
 0x312   :  { %v561_v1 = vsel %vm51_vm0, %v541_v63, 0.0 }
 0x313   :  { %v562_v3 = vrot.slane %v561_v1, 4  ;;  %v517_v5 = vpop.permute.xlu0 %516  ;;  %v557_v15 = vrot.slane %v556_v7, 2  ;;  %v552_v50 = vrot.slane %v551_v34, 1 }
 0x314   :  { %v542_v6 = vmul.f32 %v517_v5, %v1337_v38 }
 0x315   :  { %v563_v10 = vadd.f32 %v562_v3, %v561_v1  ;;  %v558_v28 = vadd.f32 %v557_v15, %v556_v7  ;;  %v553_v54 = vadd.f32 %v552_v50, %v551_v34  ;;  %v1130_v34 = vld [vmem:[%s1614_s5 + $0x8] sm:$0xff]  }
 0x316   :  { %v568_v13 = vsel %vm51_vm0, %v542_v6, 0.0  ;;  %v44_v50 = vld [vmem:[%s1609_s0 + $0x8] sm:$0xff] }
 0x317   :  { %v569_v11 = vrot.slane %v568_v13, 4  ;;  %v522_v12 = vpop.permute.xlu0 %521  ;;  %v564_v18 = vrot.slane %v563_v10, 2  ;;  %v559_v41 = vrot.slane %v558_v28, 1  ;;  %v603_v59 = vpack.c.bf16 %v553_v54, %v553_v54 }
 0x318   :  { %v543_v14 = vmul.f32 %v522_v12, %v1328_v31 }
 0x319   :  { %v570_v16 = vadd.f32 %v569_v11, %v568_v13  ;;  %v565_v32 = vadd.f32 %v564_v18, %v563_v10  ;;  %v560_v8 = vadd.f32 %v559_v41, %v558_v28  ;;  %v630_v10 = vunpack.c.l.b16 %v603_v59 }
 0x31a   :  { %v575_v17 = vsel %vm51_vm0, %v543_v14, 0.0 }
 0x31b   :  { %v571_v22 = vrot.slane %v570_v16, 2  ;;  %v576_v26 = vrot.slane %v575_v17, 4  ;;  %v527_v27 = vpop.permute.xlu0 %526  ;;  %v566_v45 = vrot.slane %v565_v32, 1  ;;  %v604_v43 = vpack.c.bf16 %v560_v8, %v560_v8 }
 0x31c   :  { %v544_v38 = vmul.f32 %v527_v27, %v1317_v20 }
 0x31d   :  { %v577_v29 = vadd.f32 %v576_v26, %v575_v17  ;;  %v572_v35 = vadd.f32 %v571_v22, %v570_v16  ;;  %v567_v53 = vadd.f32 %v566_v45, %v565_v32  ;;  %v631_v2 = vunpack.c.l.b16 %v604_v43 }
 0x31e   :  { %v582_v33 = vsel %vm51_vm0, %v544_v38, 0.0 }
 0x31f   :  { %v578_v36 = vrot.slane %v577_v29, 2  ;;  %v532_v31 = vpop.permute.xlu0 %531  ;;  %v583_v37 = vrot.slane %v582_v33, 4  ;;  %v573_v20 = vrot.slane %v572_v35, 1  ;;  %v605_v61 = vpack.c.bf16 %v567_v53, %v567_v53 }
 0x320   :  { %v545_v40 = vmul.f32 %v532_v31, %v1347_v44  ;;  %v638_v14 = vsel %vm290_vm1, %v631_v2, %v630_v10 }
 0x321   :  { %v579_v42 = vadd.f32 %v578_v36, %v577_v29  ;;  %v584_v46 = vadd.f32 %v583_v37, %v582_v33  ;;  %v574_v25 = vadd.f32 %v573_v20, %v572_v35  ;;  %v632_v7 = vunpack.c.l.b16 %v605_v61  ;;  %v1129_v33 = vld [vmem:[%s1614_s5] sm:$0xff]   ;;  %v1131_v35 = vld [vmem:[%s1614_s5 + $0x10] sm:$0xff]  }
 0x322   :  { %v589_v47 = vsel %vm51_vm0, %v545_v40, 0.0  ;;  %v1026_v36 = vld [vmem:[%s1613_s4] ss:$0 sm:$0xff] }
 0x323   :  { %v590_v9 = vrot.slane %v589_v47, 4  ;;  %v537_v51 = vpop.permute.xlu0 %536  ;;  %v580_v52 = vrot.slane %v579_v42, 1  ;;  %v585_v55 = vrot.slane %v584_v46, 2  ;;  %v606_v63 = vpack.c.bf16 %v574_v25, %v574_v25  ;;  %v48_v25 = vld [vmem:[%s1609_s0 + $0x28] sm:$0xff] }
 0x324   :  { %v546_v56 = vmul.f32 %v537_v51, %v1355_v48  ;;  %v639_v18 = vsel %vm292_vm2, %v632_v7, %v638_v14  ;;  %v45_v51 = vld [vmem:[%s1609_s0 + $0x10] sm:$0xff]  ;;  %v87_v61 = vsel %vm51_vm0, %v48_v25, 0.0 }
 0x325   :  { %v591_v23 = vadd.f32 %v590_v9, %v589_v47  ;;  %v586_v24 = vadd.f32 %v585_v55, %v584_v46  ;;  %v581_v4 = vadd.f32 %v580_v52, %v579_v42  ;;  %v633_v13 = vunpack.c.l.b16 %v606_v63  ;;  %v1132_v42 = vld [vmem:[%s1614_s5 + $0x18] sm:$0xff]   ;;  %v43_v47 = vld [vmem:[%s1609_s0] sm:$0xff] }
 0x326   :  { %v596_v44 = vsel %vm51_vm0, %v546_v56, 0.0  ;;  %v52_v20 = vsel %vm51_vm0, %v43_v47, 0.0  ;;  %v59_v9 = vsel %vm51_vm0, %v44_v50, 0.0  ;;  %v46_v56 = vld [vmem:[%s1609_s0 + $0x18] sm:$0xff]  ;;  %v66_v8 = vsel %vm51_vm0, %v45_v51, 0.0 }
 0x327   :  { %v592_v57 = vrot.slane %v591_v23, 2  ;;  %v597_v30 = vrot.slane %v596_v44, 4  ;;  %v587_v39 = vrot.slane %v586_v24, 1  ;;  %v607_v1 = vpack.c.bf16 %v581_v4, %v581_v4 }
 0x328   :  { %v640_v21 = vsel %vm294_vm3, %v633_v13, %v639_v18  ;;  %v53_v52 = vrot.slane %v52_v20, 4  ;;  %v60_v55 = vrot.slane %v59_v9, 4  ;;  %v67_v53 = vrot.slane %v66_v8, 4 }
 0x329   :  { %v593_v49 = vadd.f32 %v592_v57, %v591_v23  ;;  %v598_v60 = vadd.f32 %v597_v30, %v596_v44  ;;  %v588_v62 = vadd.f32 %v587_v39, %v586_v24  ;;  %v634_v12 = vunpack.c.l.b16 %v607_v1  ;;  %v47_v23 = vld [vmem:[%s1609_s0 + $0x20] sm:$0xff] }
 0x32a   :  { %v73_v24 = vsel %vm51_vm0, %v46_v56, 0.0  ;;  %v54_v44 = vadd.f32 %v53_v52, %v52_v20  ;;  %v61_v54 = vadd.f32 %v60_v55, %v59_v9  ;;  %v80_v30 = vsel %vm51_vm0, %v47_v23, 0.0 }
 0x32b   :  { %v594_v48 = vrot.slane %v593_v49, 1  ;;  %v599_v0 = vrot.slane %v598_v60, 2  ;;  %v608_v3 = vpack.c.bf16 %v588_v62, %v588_v62  ;;  %v641_v26 = vsel %vm296_vm4, %v634_v12, %v640_v21 }
 0x32c   :  { %v74_v57 = vrot.slane %v73_v24, 4  ;;  %v68_v4 = vadd.f32 %v67_v53, %v66_v8  ;;  %v55_v39 = vrot.slane %v54_v44, 2  ;;  %v62_v43 = vrot.slane %v61_v54, 2 }
 0x32d   :  { %v595_v5 = vadd.f32 %v594_v48, %v593_v49  ;;  %v600_v6 = vadd.f32 %v599_v0, %v598_v60  ;;  %v635_v15 = vunpack.c.l.b16 %v608_v3  ;;  %v49_v49 = vld [vmem:[%s1609_s0 + $0x30] sm:$0xff]  ;;  %v81_v60 = vrot.slane %v80_v30, 4  ;;  %v50_v0 = vld [vmem:[%s1609_s0 + $0x38] sm:$0xff] }
 0x32e   :  { %v75_v62 = vadd.f32 %v74_v57, %v73_v24  ;;  %v69_v59 = vrot.slane %v68_v4, 2  ;;  %v56_v63 = vadd.f32 %v55_v39, %v54_v44  ;;  %v63_v48 = vadd.f32 %v62_v43, %v61_v54  ;;  %v1133_v39 = vld [vmem:[%s1616_s7] sm:$0xff]  }
 0x32f   :  { %v609_v19 = vpack.c.bf16 %v595_v5, %v595_v5  ;;  %v601_v11 = vrot.slane %v600_v6, 1  ;;  %v642_v38 = vsel %vm298_vm5, %v635_v15, %v641_v26  ;;  %v88_v1 = vrot.slane %v87_v61, 4 }
 0x330   :  { %v94_v2 = vsel %vm51_vm0, %v49_v49, 0.0  ;;  %v82_v3 = vadd.f32 %v81_v60, %v80_v30  ;;  %v76_v5 = vrot.slane %v75_v62, 2  ;;  %v101_v10 = vsel %vm51_vm0, %v50_v0, 0.0  ;;  %v1134_v49 = vld [vmem:[%s1616_s7 + $0x8] sm:$0xff]   ;;  %v1030_v60 = vld [vmem:[%s1615_s6] ss:$0 sm:$0xff] }
 0x331   :  { %v602_v16 = vadd.f32 %v601_v11, %v600_v6  ;;  %v636_v17 = vunpack.c.l.b16 %v609_v19  ;;  %v70_v6 = vadd.f32 %v69_v59, %v68_v4  ;;  %v95_v7 = vrot.slane %v94_v2, 4 }
 0x332   :  { %v57_v13 = vrot.slane %v56_v63, 1  ;;  %v64_v19 = vrot.slane %v63_v48, 1  ;;  %v89_v11 = vadd.f32 %v88_v1, %v87_v61  ;;  %v83_v12 = vrot.slane %v82_v3, 2 }
 0x333   :  { %v610_v22 = vpack.c.bf16 %v602_v16, %v602_v16  ;;  %v643_v28 = vsel %vm300_vm6, %v636_v17, %v642_v38  ;;  %v77_v14 = vadd.f32 %v76_v5, %v75_v62  ;;  %v102_v15 = vrot.slane %v101_v10, 4 }
 0x334   :  { %v71_v16 = vrot.slane %v70_v6, 1  ;;  %v96_v18 = vadd.f32 %v95_v7, %v94_v2  ;;  %v58_v17 = vadd.f32 %v57_v13, %v56_v63  ;;  %v65_v21 = vadd.f32 %v64_v19, %v63_v48  ;;  %v1036_v2 = vld [vmem:[%s1617_s8] ss:$0 sm:$0xff]  ;;  %v1136_v19 = vld [vmem:[%s1618_s9 + $0x8] sm:$0xff]  }
 0x335   :  { %v637_v27 = vunpack.c.l.b16 %v610_v22  ;;  %v90_v22 = vrot.slane %v89_v11, 2  ;;  %v84_v26 = vadd.f32 %v83_v12, %v82_v3  ;;  %v103_v38 = vadd.f32 %v102_v15, %v101_v10  ;;  %v1135_v13 = vld [vmem:[%s1618_s9] sm:$0xff]   ;;  %v1138_v12 = vld [vmem:[%s1618_s9 + $0x18] sm:$0xff]  }
 0x336   :  { %1098 = vmatpush3.bf16.msra.mxu0 %v1135_v13 }
 0x337   :  { %v644_v29 = vsel %vm302_vm7, %v637_v27, %v643_v28  ;;  %v78_v27 = vrot.slane %v77_v14, 1  ;;  %v72_v28 = vadd.f32 %v71_v16, %v70_v6  ;;  %1099 = vmatprep.subr.bf16.mxu0 %v1217_v58 }
 0x338   :  { %v645_v32 = vpack.c.b16 %v644_v29, %v644_v29  ;;  %v97_v29 = vrot.slane %v96_v18, 2 }
 0x33a   :  { %1074 = vmatmul.mubr.msk.bf16.vlgmr.msra.gmra.mrb[0].mxu1 %vm51_vm0, %v645_v32  ;;  %v109_v32 = vmul.f32 0.125, %v58_v17  ;;  %1100 = vmatpush3.bf16.msra.mxu0 %v1136_v19  ;;  %v1139_v17 = vld [vmem:[%s1618_s9 + $0x20] sm:$0xff]  }
 0x33b   :  { %1085 = vmatprep.mubr.msk.bf16.mxu1 %vm1218_vm9, %v1217_v58  ;;  %1078 = vmatpush3.bf16.msra.mxu1 %v1129_v33  ;;  %v110_v33 = vmul.f32 0.125, %v65_v21  ;;  %v1140_v21 = vld [vmem:[%s1618_s9 + $0x28] sm:$0xff]  }
 0x33c   :  { %1079 = vmatprep.subr.bf16.mxu1 %v1217_v58  ;;  %1101 = vmatprep.subr.bf16.mxu0 %v1217_v58 }
 0x33f   :  { %1080 = vmatpush3.bf16.msra.mxu1 %v1130_v34  ;;  %v91_v34 = vadd.f32 %v90_v22, %v89_v11  ;;  %v1137_v11 = vld [vmem:[%s1618_s9 + $0x10] sm:$0xff]  }
 0x340   :  { %1081 = vmatprep.subr.bf16.mxu1 %v1217_v58  ;;  %1102 = vmatpush3.bf16.msra.mxu0 %v1137_v11  ;;  %v1141_v22 = vld [vmem:[%s1618_s9 + $0x30] sm:$0xff]  }
 0x341   :  { %1103 = vmatprep.subr.bf16.mxu0 %v1217_v58 }
 0x343   :  { %1082 = vmatpush3.bf16.msra.mxu1 %v1131_v35  ;;  %v85_v35 = vrot.slane %v84_v26, 1 }
 0x344   :  { %1083 = vmatprep.subr.bf16.mxu1 %v1217_v58  ;;  %1104 = vmatpush3.bf16.msra.mxu0 %v1138_v12 }
 0x345   :  { %1105 = vmatprep.subr.bf16.mxu0 %v1217_v58 }
 0x347   :  { %1084 = vmatpush3.bf16.msra.mxu1 %v1132_v42  ;;  %v92_v42 = vrot.slane %v91_v34, 1 }
 0x348   :  { %1089 = vmatprep.subr.bf16.mxu1 %v1217_v58  ;;  %1106 = vmatpush3.bf16.msra.mxu0 %v1139_v17 }
 0x349   :  { %v93_v9 = vadd.f32 %v92_v42, %v91_v34  ;;  %1107 = vmatprep.subr.bf16.mxu0 %v1217_v58 }
 0x34b   :  { %v114_v8 = vmul.f32 0.125, %v93_v9 }
 0x34c   :  { %1108 = vmatpush3.bf16.msra.mxu0 %v1140_v21 }
 0x34d   :  { %1109 = vmatprep.subr.bf16.mxu0 %v1217_v58 }
 0x350   :  { %1110 = vmatpush3.bf16.msra.mxu0 %v1141_v22 }
 0x351   :  { %1111 = vmatprep.subr.bf16.mxu0 %v1217_v58 }
 0x40d   :  { %v695_v31 = vpop.f32.mrb[0].mxu1 }
 0x40e   :  { %v696_v37 = vadd.f32 %v1026_v36, %v695_v31  ;;  %v1075_v40 = vpop.f32.mrb[1].mxu1  ;;  %v79_v36 = vadd.f32 %v78_v27, %v77_v14  ;;  %v104_v31 = vrot.slane %v103_v38, 2 }
 0x40f   :  { %v698_v41 = vpop.f32.mrb[2].mxu1  ;;  %v111_v40 = vmul.f32 0.125, %v72_v28 }
 0x410   :  { %1161 = vtanh.f32 %v696_v37  ;;  %v1076_v45 = vpop.f32.mrb[3].mxu1  ;;  %v98_v37 = vadd.f32 %v97_v29, %v96_v18  ;;  %v710_v41 = vsel %vm290_vm1, %v110_v33, %v109_v32  ;;  %v112_v47 = vmul.f32 0.125, %v79_v36 }
 0x411   :  { %v86_v45 = vadd.f32 %v85_v35, %v84_v26  ;;  %v711_v20 = vsel %vm292_vm2, %v111_v40, %v710_v41  ;;  %v1142_v26 = vld [vmem:[%s1618_s9 + $0x38] sm:$0xff]  }
 0x412   :  { %v99_v50 = vrot.slane %v98_v37, 1  ;;  %v712_v55 = vsel %vm294_vm3, %v112_v47, %v711_v20  ;;  %1112 = vmatpush3.bf16.msra.mxu0 %v1142_v26 }
 0x413   :  { %v113_v51 = vmul.f32 0.125, %v86_v45 }
 0x414   :  { %v100_v56 = vadd.f32 %v99_v50, %v98_v37 }
 0x415   :  { %v713_v23 = vsel %vm296_vm4, %v113_v51, %v712_v55 }
 0x416   :  { %v115_v24 = vmul.f32 0.125, %v100_v56  ;;  %v714_v44 = vsel %vm298_vm5, %v114_v8, %v713_v23 }
 0x418   :  { %v715_v25 = vsel %vm300_vm6, %v115_v24, %v714_v44 }
 0x41a   :  { %v1162_v46 = vpop.eup %1161 }
 0x41b   :  { %719 = vrot.lane.b32.xlu1 %v1162_v46, %s1219_s13  ;;  %v105_v46 = vadd.f32 %v104_v31, %v103_v38 }
 0x41d   :  { %v106_v52 = vrot.slane %v105_v46, 1 }
 0x41f   :  { %v107_v53 = vadd.f32 %v106_v52, %v105_v46 }
 0x421   :  { %v116_v54 = vmul.f32 0.125, %v107_v53 }
 0x423   :  { %v716_v57 = vsel %vm302_vm7, %v116_v54, %v715_v25 }
 0x48d   :  { %v720_v30 = vpop.permute.xlu1 %719 }
 0x48e   :  { %v722_v4 = vsel %vm51_vm0, %v716_v57, %v720_v30 }
 0x48f   :  { %v723_v43 = vpack.c.bf16 %v722_v4, %v722_v4 }
 0x491   :  { %1086 = vmatmul.mubr.msk.bf16.vlgmr.msra.gmra.mrb[4].mxu1 %vm763_vm10, %v723_v43 }
 0x492   :  { %1090 = vmatpush3.bf16.msra.mxu1 %v1133_v39  ;;  %1093 = vmatprep.mubr.msk.bf16.mxu1 %vm1218_vm9, %v1217_v58 }
 0x493   :  { %1091 = vmatprep.subr.bf16.mxu1 %v1217_v58 }
 0x496   :  { %1092 = vmatpush3.bf16.msra.mxu1 %v1134_v49 }
 0x564   :  { %v801_v61 = vpop.f32.mrb[4].mxu1 }
 0x565   :  { %v802_v62 = vadd.f32 %v1030_v60, %v801_v61  ;;  %v1087_v59 = vpop.f32.mrb[5].mxu1 }
 0x566   :  { %v804_v63 = vpop.f32.mrb[6].mxu1 }
 0x567   :  { %v807_v48 = vmax.f32 %v802_v62, 0.0  ;;  %v1088_v0 = vpop.f32.mrb[7].mxu1 }
 0x569   :  { %v808_v1 = vpack.c.bf16 %v807_v48, %v807_v48 }
 0x56b   :  { %1094 = vmatmul.mubr.msk.bf16.vlgmr.msra.gmra.mrb[8].mxu1 %vm51_vm0, %v808_v1 }
 0x63e   :  { %v869_v3 = vpop.f32.mrb[8].mxu1 }
 0x63f   :  { %v870_v5 = vadd.f32 %v1036_v2, %v869_v3  ;;  %v1095_v6 = vpop.f32.mrb[9].mxu1 }
 0x640   :  { %v872_v7 = vpop.f32.mrb[10].mxu1 }
 0x641   :  { %875 = vmax.xlane.f32.xlu0 %v870_v5  ;;  %v1096_v10 = vpop.f32.mrb[11].mxu1 }
 0x6ce   :  { %v876_v14 = vpop.xlane.xlu0 %875 }
 0x6cf   :  { %v877_v15 = vsub.f32 %v870_v5, %v876_v14 }
 0x6d1   :  { %v878_v16 = vmul.f32 1.442695, %v877_v15 }
 0x6d3   :  { %1163 = vpow2.f32 %v878_v16 }
 0x6dd   :  { %v1164_v18 = vpop.eup %1163 }
 0x6de   :  { %880 = vadd.xlane.f32.xlu1 %v1164_v18 }
 0x76b   :  { %v881_v27 = vpop.xlane.xlu1 %880 }
 0x76c   :  { %1165 = vrcp.f32 %v881_v27 }
 0x776   :  { %v1166_v38 = vpop.eup %1165 }
 0x777   :  { %v883_v28 = vmul.f32 %v1166_v38, %v1164_v18 }
 0x779   :  { %v884_v29 = vpack.c.bf16 %v883_v28, %v883_v28  ;;  %996 = vst [vmem:[#allocation4] sm:$0xff] %v883_v28 }
 0x77b   :  { %1114 = vmatmul.mubr.bf16.vlgmr.msra.gmra.mrb[0].mxu0 %v884_v29 }
 0x77c   :  { %1178 = shalt.err (!%p1175_p4)
}
 0x77d   :  { %s1179_s25 = scalar_lea.hbm %s1621_s12, 128 }
 0x77e   :  { %p1180_p5 = scmp.ne.s32.totalorder %s1621_s12, %s1179_s25  ;;  %p1183_p6 = scmp.lt.u32.totalorder %s1179_s25, %s1621_s12 }
 0x780   :  { %p1185_p7 = pnand %p1183_p6, %p1180_p5 }
 0x782   :  { %1188 = shalt.err (!%p1185_p7)
}
 0x783   :  { %1017 = dma.vmem_to_hbm [thread:$0]  %s1015_s24, 128, %s1621_s12, [#allocation5]   ;;  %v1040_v58 = vld [vmem:[%s1619_s10] ss:$0 sm:$0xff] }
 0x784   :  { %s1221_s14 = smov [#allocation2]  }
 0x785   :  { %s1004_s15 = sshll.u32 %s1221_s14, 4  ;;  %s1005_s15 = int_to_ptr.vmem [resolvable:$true] %s1004_s15 }
 0x786   :  { %s1189_s4 = scalar_lea.vmem %s1005_s15, 128  ;;  %p1194_p9 = scmp.lt.s32.totalorder %s1005_s15, %s1005_s15 }
 0x787   :  { %p1190_p8 = scmp.ne.s32.totalorder %s1005_s15, %s1189_s4  ;;  %p1195_p10 = scmp.lt.s32.totalorder %s1189_s4, %s1189_s4 }
 0x789   :  { %p1196_p11 = por %p1195_p10, %p1194_p9 }
 0x78b   :  { %p1197_p12 = pnand %p1196_p11, %p1190_p8 }
 0x84e   :  { %v990_v32 = vpop.f32.mrb[0].mxu0 }
 0x84f   :  { %v991_v33 = vadd.f32 %v1040_v58, %v990_v32  ;;  %v1115_v34 = vpop.f32.mrb[1].mxu0 }
 0x850   :  { %v993_v35 = vpop.f32.mrb[2].mxu0 }
 0x851   :  { %997 = vst [vmem:[#allocation2] sm:$0xff] %v991_v33  ;;  %v1116_v36 = vpop.f32.mrb[3].mxu0 }
 0x852   :  { %1200 = shalt.err (!%p1197_p12)
}
 0x853   :  { %s1201_s10 = scalar_lea.hbm %s1620_s11, 128 }
 0x854   :  { %p1202_p13 = scmp.ne.s32.totalorder %s1620_s11, %s1201_s10  ;;  %p1205_p0 = scmp.lt.u32.totalorder %s1201_s10, %s1620_s11 }
 0x856   :  { %p1207_p1 = pnand %p1205_p0, %p1202_p13 }
 0x858   :  { %1210 = shalt.err (!%p1207_p1)
}
 0x859   :  { %1007 = dma.vmem_to_hbm [thread:$0]  %s1005_s15, 128, %s1620_s11, [#allocation3]  }
 0x85a   :  { %1211 = dma.done.wait [#allocation3], 128  }
 0x85b   :  { %1212 = vsyncadd [#allocation3], 4294967168 }
 0x85c   :  { %1213 = dma.done.wait [#allocation5], 128  }
 0x85d   :  { %1214 = vsyncadd [#allocation5], 4294967168 }
 0x85e   :  { %1024 = vsyncpa [#allocation3], 1 }
 0x85f   :  { %1025 = vsyncpa [#allocation5], 1 }

</bundles_post_ra>
